<compile_context>
chip_gen: v7x
topology: tpu7x:2x2x1
jax: 0.10.0
libtpu: 0.0.40
codegen_flags: <defaults>
</compile_context>

<pallas_src>
import functools

import jax
import jax.numpy as jnp
from jax import lax
from jax.experimental import pallas as pl
from jax.experimental.pallas import tpu as pltpu


# ----------------------------- tiling helper --------------------------------

def _pick_tile(dim, target, align):
    """Largest block <= target that is a multiple of `align` and divides `dim`;
    falls back to the full dim (always a legal Pallas block shape).
    TODO(synk): pad / cdiv the grid instead of the full-dim fallback so huge
    prime-ish dims cannot silently overshoot the VMEM limit."""
    if dim <= target:
        return dim
    t = (target // align) * align
    while t >= align:
        if dim % t == 0:
            return t
        t -= align
    return dim


# ------------------------- tiled linear (matmul) -----------------------------

def _linear_kernel_acc(x_ref, w_ref, b_ref, o_ref, acc_ref):
    """K-accumulated matmul: grid (M/tm, N/tn, K/tk), f32 VMEM accumulator."""
    @pl.when(pl.program_id(2) == 0)
    def _():
        acc_ref[...] = jnp.zeros_like(acc_ref)

    acc_ref[...] += jnp.dot(
        x_ref[...].astype(jnp.bfloat16),
        w_ref[...].astype(jnp.bfloat16),
        preferred_element_type=jnp.float32)

    @pl.when(pl.program_id(2) == pl.num_programs(2) - 1)
    def _():
        o_ref[...] = (acc_ref[...] + b_ref[...]).astype(o_ref.dtype)


def _linear_kernel_single_k(x_ref, w_ref, b_ref, o_ref):
    """Whole-K matmul (K fits one tile): no scratch round-trip, bias fused."""
    y = jnp.dot(x_ref[...].astype(jnp.bfloat16),
                w_ref[...].astype(jnp.bfloat16),
                preferred_element_type=jnp.float32)
    o_ref[...] = (y + b_ref[...]).astype(o_ref.dtype)


def linear(x, w, b, *, out_dtype=None, tm=256, tn=512, tk=512):
    """y = x @ w + b, tiled over (M, N, K).  bf16 MXU operands, f32 accumulation.
    Tile targets suit v5e/v6e (128 MiB VMEM) and stay well under v7x's 32 MiB
    scoped default even with double-buffering."""
    M, K = x.shape
    N = w.shape[1]
    out_dtype = out_dtype or x.dtype
    tm = _pick_tile(M, tm, 8)
    tn = _pick_tile(N, tn, 128)
    tk = _pick_tile(K, tk, 128)
    b2 = b.reshape(1, N)

    if K // tk == 1:
        # Fast path: K fits a single tile -> no accumulator scratch needed.
        return pl.pallas_call(
            _linear_kernel_single_k,
            out_shape=jax.ShapeDtypeStruct((M, N), out_dtype),
            grid=(M // tm, N // tn),
            in_specs=[
                pl.BlockSpec((tm, K), lambda i, j: (i, 0)),
                pl.BlockSpec((K, tn), lambda i, j: (0, j)),
                pl.BlockSpec((1, tn), lambda i, j: (0, j)),
            ],
            out_specs=pl.BlockSpec((tm, tn), lambda i, j: (i, j)),
            compiler_params=pltpu.CompilerParams(
                dimension_semantics=("parallel", "parallel")),
        )(x, w, b2)

    return pl.pallas_call(
        _linear_kernel_acc,
        out_shape=jax.ShapeDtypeStruct((M, N), out_dtype),
        grid=(M // tm, N // tn, K // tk),
        in_specs=[
            pl.BlockSpec((tm, tk), lambda i, j, k: (i, k)),
            pl.BlockSpec((tk, tn), lambda i, j, k: (k, j)),
            pl.BlockSpec((1, tn), lambda i, j, k: (0, j)),
        ],
        out_specs=pl.BlockSpec((tm, tn), lambda i, j, k: (i, j)),
        scratch_shapes=[pltpu.VMEM((tm, tn), jnp.float32)],
        compiler_params=pltpu.CompilerParams(
            dimension_semantics=("parallel", "parallel", "arbitrary")),
    )(x, w, b2)


# ---------------------- flash attention (online softmax) ---------------------

def _flash_attn_kernel(*refs, num_heads, has_mask):
    if has_mask:
        q_ref, k_ref, v_ref, mask_ref, o_ref, acc_ref, m_ref, l_ref = refs
    else:
        q_ref, k_ref, v_ref, o_ref, acc_ref, m_ref, l_ref = refs
        mask_ref = None

    kv_step = pl.program_id(2)
    tq, D = q_ref.shape
    dk = D // num_heads

    @pl.when(kv_step == 0)
    def _():
        m_ref[...] = jnp.full_like(m_ref, -jnp.inf)
        l_ref[...] = jnp.zeros_like(l_ref)
        acc_ref[...] = jnp.zeros_like(acc_ref)

    if has_mask:
        # Additive bias built in-kernel from the streamed int32 mask tile.
        bias = jnp.where(mask_ref[...] == 0,
                         jnp.float32(-1e9), jnp.float32(0.0))       # (tq, tkv)

    for h in range(num_heads):                      # all heads per grid step
        sl = slice(h * dk, (h + 1) * dk)
        qh = q_ref[:, sl].astype(jnp.bfloat16)      # (tq,  dk)
        kh = k_ref[:, sl].astype(jnp.bfloat16)      # (tkv, dk)
        vh = v_ref[:, sl].astype(jnp.bfloat16)      # (tkv, dk)

        # NOTE: no 1/sqrt(d_k) scaling -- matches the reference PyTorch module.
        # K-transpose is fused into the MXU contraction (no materialized .T).
        s = lax.dot_general(qh, kh, (((1,), (1,)), ((), ())),
                            preferred_element_type=jnp.float32)     # (tq, tkv)
        if has_mask:
            s = s + bias

        m_prev = m_ref[:, h:h + 1]
        l_prev = l_ref[:, h:h + 1]
        m_new = jnp.maximum(m_prev, jnp.max(s, axis=-1, keepdims=True))
        alpha = jnp.exp(m_prev - m_new)
        p = jnp.exp(s - m_new)
        l_ref[:, h:h + 1] = alpha * l_prev + jnp.sum(p, axis=-1, keepdims=True)
        acc_ref[:, sl] = alpha * acc_ref[:, sl] + jnp.dot(
            p.astype(jnp.bfloat16), vh, preferred_element_type=jnp.float32)
        m_ref[:, h:h + 1] = m_new

    @pl.when(kv_step == pl.num_programs(2) - 1)
    def _():
        inv = pl.reciprocal(l_ref[...], approx=True)                # (tq, H)
        pieces = [acc_ref[:, h * dk:(h + 1) * dk] * inv[:, h:h + 1]
                  for h in range(num_heads)]
        # Single lane-dense (tq, D) store.
        o_ref[...] = jnp.concatenate(pieces, axis=-1).astype(o_ref.dtype)


def attention(q_arr, k_arr, v_arr, mask, *, num_heads, d_model,
              q_col=0, k_col=0, v_col=0, tq_target=128, tkv_target=512):
    """q/k/v are (B, S, n*D) slabs; *_col picks the D-wide column block so the
    fused (B, S, 3D) QKV slab is sliced purely via BlockSpec DMA.  Flash
    (online-softmax) over the key/value axis.  mask=None compiles a no-mask
    kernel variant; otherwise mask broadcastable to (B, Sq, Sk), nonzero=keep."""
    B, Sq = q_arr.shape[0], q_arr.shape[1]
    Sk = k_arr.shape[1]
    D = d_model
    tq = _pick_tile(Sq, tq_target, 8)
    tkv = _pick_tile(Sk, tkv_target, 128)
    has_mask = mask is not None

    in_specs = [
        pl.BlockSpec((None, tq, D), lambda b, i, j, c=q_col: (b, i, c)),
        pl.BlockSpec((None, tkv, D), lambda b, i, j, c=k_col: (b, j, c)),
        pl.BlockSpec((None, tkv, D), lambda b, i, j, c=v_col: (b, j, c)),
    ]
    args = [q_arr, k_arr, v_arr]
    if has_mask:
        mask_i32 = jnp.broadcast_to(mask, (B, Sq, Sk)).astype(jnp.int32)
        in_specs.append(
            pl.BlockSpec((None, tq, tkv), lambda b, i, j: (b, i, j)))
        args.append(mask_i32)

    return pl.pallas_call(
        functools.partial(_flash_attn_kernel, num_heads=num_heads,
                          has_mask=has_mask),
        out_shape=jax.ShapeDtypeStruct((B, Sq, D), jnp.bfloat16),
        grid=(B, Sq // tq, Sk // tkv),
        in_specs=in_specs,
        out_specs=pl.BlockSpec((None, tq, D), lambda b, i, j: (b, i, 0)),
        scratch_shapes=[
            pltpu.VMEM((tq, D), jnp.float32),           # output accumulator
            pltpu.VMEM((tq, num_heads), jnp.float32),   # running max per head
            pltpu.VMEM((tq, num_heads), jnp.float32),   # running sum per head
        ],
        compiler_params=pltpu.CompilerParams(
            dimension_semantics=("parallel", "parallel", "arbitrary")),
    )(*args)


# --------------------------- MHA forward pass --------------------------------

def mha_forward(packed, q, k, v, mask=None, *, num_heads):
    """Matches MultiHeadAttention.forward(q, k, v, mask).
    mask: broadcastable to (B, Sq, Sk), nonzero = keep (broadcast over heads)."""
    B, Sq, D = q.shape
    Sk = k.shape[1]

    if (q is k) and (k is v):
        # Self-attention: one fused QKV matmul; attention reads the Q/K/V
        # columns of the bf16 (B, S, 3D) slab via BlockSpec offsets.
        qkv = linear(q.reshape(B * Sq, D), packed["w_qkv"], packed["b_qkv"],
                     out_dtype=jnp.bfloat16).reshape(B, Sq, 3 * D)
        ctx = attention(qkv, qkv, qkv, mask, num_heads=num_heads, d_model=D,
                        q_col=0, k_col=1, v_col=2)
    else:
        Q = linear(q.reshape(B * Sq, D), packed["wq"], packed["bq"],
                   out_dtype=jnp.bfloat16).reshape(B, Sq, D)
        K = linear(k.reshape(B * Sk, D), packed["wk"], packed["bk"],
                   out_dtype=jnp.bfloat16).reshape(B, Sk, D)
        V = linear(v.reshape(B * Sk, D), packed["wv"], packed["bv"],
                   out_dtype=jnp.bfloat16).reshape(B, Sk, D)
        ctx = attention(Q, K, V, mask, num_heads=num_heads, d_model=D)

    out = linear(ctx.reshape(B * Sq, D), packed["wo"], packed["bo"],
                 out_dtype=jnp.float32)
    return out.reshape(B, Sq, D)


# --------------------------- params & reference ------------------------------

def init_mha_params(key, d_model):
    """f32 parameters (nn.Linear-style uniform init)."""
    def lin(k):
        k1, k2 = jax.random.split(k)
        bound = 1.0 / (d_model ** 0.5)
        w = jax.random.uniform(k1, (d_model, d_model), jnp.float32, -bound, bound)
        b = jax.random.uniform(k2, (d_model,), jnp.float32, -bound, bound)
        return w, b
    kq, kk, kv, ko = jax.random.split(key, 4)
    wq, bq = lin(kq)
    wk, bk = lin(kk)
    wv, bv = lin(kv)
    wo, bo = lin(ko)
    return dict(wq=wq, bq=bq, wk=wk, bk=bk, wv=wv, bv=bv, wo=wo, bo=bo)


def pack_mha_params(params):
    """One-time packing for the kernels: bf16 weights (halves weight DMA) plus
    the pre-concatenated (D, 3D) QKV weight/bias for the fused self-attn path.
    Biases stay f32 (added to the f32 accumulator)."""
    bf = jnp.bfloat16
    packed = {k: params[k].astype(bf) for k in ("wq", "wk", "wv", "wo")}
    packed.update({k: params[k] for k in ("bq", "bk", "bv", "bo")})
    packed["w_qkv"] = jnp.concatenate(
        [params["wq"], params["wk"], params["wv"]], axis=1).astype(bf)
    packed["b_qkv"] = jnp.concatenate([params["bq"], params["bk"], params["bv"]])
    return packed


def mha_reference(params, q, k, v, mask, *, num_heads):
    """Pure-JAX f32 reference matching the PyTorch module (no 1/sqrt(d_k))."""
    B, Sq, D = q.shape
    Sk = k.shape[1]
    dk = D // num_heads
    Q = (q @ params["wq"] + params["bq"]).reshape(B, Sq, num_heads, dk).transpose(0, 2, 1, 3)
    K = (k @ params["wk"] + params["bk"]).reshape(B, Sk, num_heads, dk).transpose(0, 2, 1, 3)
    V = (v @ params["wv"] + params["bv"]).reshape(B, Sk, num_heads, dk).transpose(0, 2, 1, 3)
    s = jnp.einsum("bhqd,bhkd->bhqk", Q, K)
    if mask is not None:
        s = jnp.where(mask[:, None, :, :] == 0, -1e9, s)
    p = jax.nn.softmax(s, axis=-1)
    ctx = jnp.einsum("bhqk,bhkd->bhqd", p, V).transpose(0, 2, 1, 3).reshape(B, Sq, D)
    return ctx @ params["wo"] + params["bo"]


# ---------------------------------- main --------------------------------------

if __name__ == "__main__":
    d_model, num_heads = 128, 4          # dk = 32; lane-aligned feature dim
    B, S = 2, 8

    key = jax.random.PRNGKey(0)
    kp, kx, kq, kk, kv = jax.random.split(key, 5)
    params = init_mha_params(kp, d_model)
    packed = pack_mha_params(params)

    # Tolerance: bf16 weights + bf16 intermediates (f32 accumulation) vs. a pure
    # f32 reference -> ~1e-2-level relative error; 5e-2 abs is tight enough to
    # catch real bugs at these magnitudes while allowing bf16 rounding.
    TOL = 5e-2

    # --- self-attention with a causal mask (fused-QKV path, masked kernel) ---
    x = jax.random.normal(kx, (B, S, d_model), jnp.float32)
    causal = jnp.broadcast_to(jnp.tril(jnp.ones((S, S), jnp.int32)), (B, S, S))
    out_self = jax.block_until_ready(
        mha_forward(packed, x, x, x, causal, num_heads=num_heads))
    assert out_self.shape == (B, S, d_model), out_self.shape
    ref_self = mha_reference(params, x, x, x, causal, num_heads=num_heads)
    err = float(jnp.max(jnp.abs(out_self - ref_self)))
    assert err < TOL, f"self-attention mismatch: {err}"

    # --- distinct q / k / v, no mask (general path, no-mask kernel variant) ---
    qx = jax.random.normal(kq, (B, S, d_model), jnp.float32)
    kx_ = jax.random.normal(kk, (B, S, d_model), jnp.float32)
    vx = jax.random.normal(kv, (B, S, d_model), jnp.float32)
    out_x = jax.block_until_ready(
        mha_forward(packed, qx, kx_, vx, None, num_heads=num_heads))
    ref_x = mha_reference(params, qx, kx_, vx, None, num_heads=num_heads)
    err = float(jnp.max(jnp.abs(out_x - ref_x)))
    assert err < TOL, f"cross-attention mismatch: {err}"

    print("KERNEL_OK")
</pallas_src>

<mosaic_0001>
module attributes {stable_mosaic.version = 11 : i64} {
  func.func @_linear_kernel_single_k(%arg0: i32, %arg1: i32, %arg2: memref<16x128xf32, #tpu.memory_space<vmem>>, %arg3: memref<128x384xbf16, #tpu.memory_space<vmem>>, %arg4: memref<1x384xf32, #tpu.memory_space<vmem>>, %arg5: memref<16x384xbf16, #tpu.memory_space<vmem>>) attributes {dimension_semantics = [#tpu.dimension_semantics<parallel>, #tpu.dimension_semantics<parallel>], iteration_bounds = array<i64: 1, 1>, scalar_prefetch = 0 : i64, scratch_operands = 0 : i64, tpu.core_type = #tpu.core_type<tc>, window_params = [{transform_indices = @transform_0, window_bounds = array<i64: 16, 128>}, {transform_indices = @transform_1, window_bounds = array<i64: 128, 384>}, {transform_indices = @transform_2, window_bounds = array<i64: 1, 384>}, {transform_indices = @transform_3, window_bounds = array<i64: 16, 384>}]} {
    %c0 = arith.constant 0 : index
    %c0_0 = arith.constant 0 : index
    %0 = vector.load %arg2[%c0, %c0_0] : memref<16x128xf32, #tpu.memory_space<vmem>>, vector<16x128xf32>
    %1 = arith.truncf %0 : vector<16x128xf32> to vector<16x128xbf16>
    %c0_1 = arith.constant 0 : index
    %c0_2 = arith.constant 0 : index
    %2 = vector.load %arg3[%c0_1, %c0_2] : memref<128x384xbf16, #tpu.memory_space<vmem>>, vector<128x384xbf16>
    %cst = arith.constant dense<0.000000e+00> : vector<16x384xf32>
    %3 = tpu.matmul %1, %2, %cst {dimension_numbers = #tpu.dot_dimension_numbers<[1], [0], [0], [1], [0, 0, 1, 1], [], []>} : vector<16x128xbf16>, vector<128x384xbf16>, vector<16x384xf32> -> vector<16x384xf32>
    %c0_3 = arith.constant 0 : index
    %c0_4 = arith.constant 0 : index
    %4 = vector.load %arg4[%c0_3, %c0_4] : memref<1x384xf32, #tpu.memory_space<vmem>>, vector<1x384xf32>
    %5 = vector.broadcast %4 : vector<1x384xf32> to vector<16x384xf32>
    %6 = arith.addf %3, %5 : vector<16x384xf32>
    %7 = arith.truncf %6 : vector<16x384xf32> to vector<16x384xbf16>
    %c0_5 = arith.constant 0 : index
    %c0_6 = arith.constant 0 : index
    %8 = vector.load %arg5[%c0_5, %c0_6] : memref<16x384xbf16, #tpu.memory_space<vmem>>, vector<16x384xbf16>
    tpu.vector_store %arg5[%c0_5, %c0_6], %7 {strides = array<i32>} : memref<16x384xbf16, #tpu.memory_space<vmem>>, vector<16x384xbf16>,
    return
  }
  func.func @transform_0(%arg0: i32, %arg1: i32) -> (i32, i32) {
    %c0_i32 = arith.constant 0 : i32
    %c0_i32_0 = arith.constant 0 : i32
    return %arg0, %c0_i32 : i32, i32
  }
  func.func @transform_1(%arg0: i32, %arg1: i32) -> (i32, i32) {
    %c0_i32 = arith.constant 0 : i32
    %c0_i32_0 = arith.constant 0 : i32
    return %c0_i32, %arg1 : i32, i32
  }
  func.func @transform_2(%arg0: i32, %arg1: i32) -> (i32, i32) {
    %c0_i32 = arith.constant 0 : i32
    %c0_i32_0 = arith.constant 0 : i32
    return %c0_i32, %arg1 : i32, i32
  }
  func.func @transform_3(%arg0: i32, %arg1: i32) -> (i32, i32) {
    %c0_i32 = arith.constant 0 : i32
    return %arg0, %arg1 : i32, i32
  }
}

</mosaic_0001>

<bundles_post_ra>
// kernel: tpu_custom_call.1
= control target key start
LH: loop header
LB: loop body
LE: loop exit
PB: predicated region body
PF: predicated region fallthrough
CT: control target
= control target key end

     0   :  { %8 = vsyncpa [#allocation3], 0  ;;  %s600_s0 = inlined_call_operand.hbm [shape: f32[16,128], index: 0, kind: input, shape index: {}]   ;;  %s601_s1 = inlined_call_operand.hbm [shape: bf16[128,384], index: 1, kind: input, shape index: {}]   ;;  %s602_s2 = inlined_call_operand.vmem [shape: f32[1,384], index: 2, kind: input, shape index: {}]   ;;  %s603_s3 = inlined_call_operand.hbm [shape: bf16[16,384], index: 3, kind: output, shape index: {}]  }
   0x1   :  { %9 = vsyncpa [#allocation6], 0 }
   0x2   :  { %10 = vsyncpa [#allocation4], 0  ;;  %s525_s12 = smov [#allocation2]   ;;  %s453_s16 = scalar_lea.hbm %s600_s0, 256 }
   0x3   :  { %s16_s13 = sshll.u32 %s525_s12, 4  ;;  %p454_p0 = scmp.ne.s32.totalorder %s600_s0, %s453_s16  ;;  %s17_s13 = int_to_ptr.vmem [resolvable:$true] %s16_s13 }
   0x4   :  { %p457_p1 = scmp.lt.u32.totalorder %s453_s16, %s600_s0 }
   0x6   :  { %p459_p2 = pnand %p457_p1, %p454_p0 }
   0x8   :  { %462 = shalt.err (!%p459_p2)
}
   0x9   :  { %s463_s21 = scalar_lea.vmem %s17_s13, 256  ;;  %p468_p4 = scmp.lt.s32.totalorder %s17_s13, %s17_s13 }
   0xa   :  { %p464_p3 = scmp.ne.s32.totalorder %s17_s13, %s463_s21  ;;  %p469_p5 = scmp.lt.s32.totalorder %s463_s21, %s463_s21 }
   0xc   :  { %p470_p6 = por %p469_p5, %p468_p4 }
   0xe   :  { %p471_p7 = pnand %p470_p6, %p464_p3 }
  0x10   :  { %474 = shalt.err (!%p471_p7)
}
  0x11   :  { %s526_s22 = smov 128   ;;  %s527_s23 = smov 8  }
  0x12   :  { %22 = dma.hbm_to_vmem [thread:$0]  %s600_s0, 256, %s17_s13, [#allocation3], %s526_s22, %s526_s22, %s527_s23  }
  0x13   :  { %s528_s26 = smov [#allocation5]   ;;  %s475_s30 = scalar_lea.hbm %s601_s1, 3072 }
  0x14   :  { %s28_s27 = sshll.u32 %s528_s26, 4  ;;  %p476_p8 = scmp.ne.s32.totalorder %s601_s1, %s475_s30  ;;  %s29_s27 = int_to_ptr.vmem [resolvable:$true] %s28_s27 }
  0x15   :  { %p479_p9 = scmp.lt.u32.totalorder %s475_s30, %s601_s1 }
  0x17   :  { %p481_p10 = pnand %p479_p9, %p476_p8 }
  0x19   :  { %484 = shalt.err (!%p481_p10)
}
  0x1a   :  { %s485_s8 = scalar_lea.vmem %s29_s27, 3072  ;;  %p490_p12 = scmp.lt.s32.totalorder %s29_s27, %s29_s27 }
  0x1b   :  { %p486_p11 = scmp.ne.s32.totalorder %s29_s27, %s485_s8  ;;  %p491_p13 = scmp.lt.s32.totalorder %s485_s8, %s485_s8 }
  0x1d   :  { %p492_p0 = por %p491_p13, %p490_p12 }
  0x1f   :  { %p493_p1 = pnand %p492_p0, %p486_p11 }
  0x21   :  { %496 = shalt.err (!%p493_p1)
}
  0x22   :  { %s529_s0 = smov 192   ;;  %s530_s9 = smov 12  }
  0x23   :  { %34 = dma.hbm_to_vmem [thread:$0]  %s601_s1, 3072, %s29_s27, [#allocation6], %s529_s0, %s529_s0, %s530_s9  }
  0x24   :  { %519 = dma.done.wait [#allocation3], 256  }
  0x25   :  { %520 = vsyncadd [#allocation3], 4294967040 }
  0x26   :  { %521 = dma.done.wait [#allocation6], 3072  }
  0x27   :  { %522 = vsyncadd [#allocation6], 4294964224  ;;  %v531_v0 = vmov 0.0   ;;  %vm532_vm0 = vmmov 0   ;;  %v533_v1 = vmov 0   ;;  %v44_v25 = vld [vmem:[#allocation2] sm:$0xff]  ;;  %v81_v29 = vlaneseq }
  0x28   :  { %391 = vmatprep.subr.bf16.mxu1 %v531_v0  ;;  %407 = vmatprep.mubr.msk.bf16.mxu1 %vm532_vm0, %v531_v0  ;;  %v421_v2 = vld [vmem:[#allocation5 + $0x4] ss:$12 sps:$4 sm:$0xff]   ;;  %v423_v3 = vld [vmem:[#allocation5 + $0x8] ss:$12 sps:$4 sm:$0xff]   ;;  %v424_v4 = vld [vmem:[#allocation5] ss:$12 sps:$4 sm:$0xff]  }
  0x29   :  { %256 = vmatprep.mubr.bf16.mxu0 %v533_v1  ;;  %224 = vmatprep.subr.bf16.mxu0 %v421_v2  ;;  %v425_v5 = vld [vmem:[#allocation5 + $0x1c] ss:$12 sps:$4 sm:$0xff]   ;;  %v427_v6 = vld [vmem:[#allocation5 + $0x20] ss:$12 sps:$4 sm:$0xff]   ;;  %v428_v7 = vld [vmem:[#allocation5 + $0x18] ss:$12 sps:$4 sm:$0xff]  }
  0x2a   :  { %392 = vmatpush3.bf16.msra.mxu1 %v423_v3  ;;  %225 = vmatpush1.bf16.msra.mxu0 %v424_v4  ;;  %v429_v8 = vld [vmem:[#allocation5 + $0x34] ss:$12 sps:$4 sm:$0xff]   ;;  %v431_v9 = vld [vmem:[#allocation5 + $0x38] ss:$12 sps:$4 sm:$0xff]   ;;  %v432_v10 = vld [vmem:[#allocation5 + $0x30] ss:$12 sps:$4 sm:$0xff]  }
  0x2b   :  { %393 = vmatprep.subr.bf16.mxu1 %v531_v0  ;;  %226 = vmatprep.subr.bf16.mxu0 %v425_v5  ;;  %v433_v11 = vld [vmem:[#allocation5 + $0x4c] ss:$12 sps:$4 sm:$0xff]   ;;  %v435_v12 = vld [vmem:[#allocation5 + $0x50] ss:$12 sps:$4 sm:$0xff]   ;;  %v436_v13 = vld [vmem:[#allocation5 + $0x48] ss:$12 sps:$4 sm:$0xff]  }
  0x2c   :  { %v437_v14 = vld [vmem:[#allocation5 + $0x64] ss:$12 sps:$4 sm:$0xff]   ;;  %v439_v15 = vld [vmem:[#allocation5 + $0x68] ss:$12 sps:$4 sm:$0xff]   ;;  %v440_v16 = vld [vmem:[#allocation5 + $0x60] ss:$12 sps:$4 sm:$0xff]  }
  0x2d   :  { %v441_v17 = vld [vmem:[#allocation5 + $0x7c] ss:$12 sps:$4 sm:$0xff]   ;;  %v443_v18 = vld [vmem:[#allocation5 + $0x80] ss:$12 sps:$4 sm:$0xff]   ;;  %v444_v19 = vld [vmem:[#allocation5 + $0x78] ss:$12 sps:$4 sm:$0xff]  }
  0x2e   :  { %394 = vmatpush3.bf16.msra.mxu1 %v427_v6  ;;  %227 = vmatpush1.bf16.msra.mxu0 %v428_v7  ;;  %v445_v20 = vld [vmem:[#allocation5 + $0x94] ss:$12 sps:$4 sm:$0xff]   ;;  %v447_v21 = vld [vmem:[#allocation5 + $0x98] ss:$12 sps:$4 sm:$0xff]   ;;  %v448_v22 = vld [vmem:[#allocation5 + $0x90] ss:$12 sps:$4 sm:$0xff]  }
  0x2f   :  { %395 = vmatprep.subr.bf16.mxu1 %v531_v0  ;;  %228 = vmatprep.subr.bf16.mxu0 %v429_v8  ;;  %v449_v23 = vld [vmem:[#allocation5 + $0xac] ss:$12 sps:$4 sm:$0xff]   ;;  %v451_v24 = vld [vmem:[#allocation5 + $0xb0] ss:$12 sps:$4 sm:$0xff]   ;;  %v452_v27 = vld [vmem:[#allocation5 + $0xa8] ss:$12 sps:$4 sm:$0xff]  }
  0x30   :  { %v45_v26 = vld [vmem:[#allocation2 + $0x8] sm:$0xff]  ;;  %v82_v30 = vshrl.u32 %v81_v29, 7  ;;  %v79_v32 = vld [vmem:[%s602_s2] sm:$0x7]  ;;  %s534_s2 = smov [#allocation7]  }
  0x31   :  { %v46_v28 = vpack.c.bf16 %v45_v26, %v44_v25  ;;  %s337_s13 = sshll.u32 %s534_s2, 4  ;;  %s338_s13 = int_to_ptr.vmem [resolvable:$true] %s337_s13 }
  0x32   :  { %396 = vmatpush3.bf16.msra.mxu1 %v431_v9  ;;  %229 = vmatpush1.bf16.msra.mxu0 %v432_v10  ;;  %v91_v31 = vsub.s32 2, %v82_v30  ;;  %v83_v33 = vsub.s32 0, %v82_v30  ;;  %v87_v34 = vsub.s32 1, %v82_v30  ;;  %s497_s14 = scalar_lea.vmem %s338_s13, 384  ;;  %p502_p3 = scmp.lt.s32.totalorder %s338_s13, %s338_s13 }
  0x33   :  { %397 = vmatprep.subr.bf16.mxu1 %v531_v0  ;;  %230 = vmatprep.subr.bf16.mxu0 %v433_v11  ;;  %p498_p2 = scmp.ne.s32.totalorder %s338_s13, %s497_s14  ;;  %p503_p4 = scmp.lt.s32.totalorder %s497_s14, %s497_s14 }
  0x34   :  { %v92_v35 = vrot.slane %v79_v32, %v91_v31  ;;  %v84_v36 = vrot.slane %v79_v32, %v83_v33  ;;  %v88_v37 = vrot.slane %v79_v32, %v87_v34 }
  0x35   :  { %p504_p5 = por %p503_p4, %p502_p3 }
  0x36   :  { %398 = vmatpush3.bf16.msra.mxu1 %v435_v12  ;;  %231 = vmatpush1.bf16.msra.mxu0 %v436_v13 }
  0x37   :  { %399 = vmatprep.subr.bf16.mxu1 %v531_v0  ;;  %232 = vmatprep.subr.bf16.mxu0 %v437_v14  ;;  %p505_p6 = pnand %p504_p5, %p498_p2 }
  0x3a   :  { %400 = vmatpush3.bf16.msra.mxu1 %v439_v15  ;;  %233 = vmatpush1.bf16.msra.mxu0 %v440_v16 }
  0x3b   :  { %401 = vmatprep.subr.bf16.mxu1 %v531_v0  ;;  %234 = vmatprep.subr.bf16.mxu0 %v441_v17 }
  0x3e   :  { %402 = vmatpush3.bf16.msra.mxu1 %v443_v18  ;;  %235 = vmatpush1.bf16.msra.mxu0 %v444_v19 }
  0x3f   :  { %403 = vmatprep.subr.bf16.mxu1 %v531_v0  ;;  %236 = vmatprep.subr.bf16.mxu0 %v445_v20 }
  0x42   :  { %404 = vmatpush3.bf16.msra.mxu1 %v447_v21  ;;  %237 = vmatpush1.bf16.msra.mxu0 %v448_v22 }
  0x43   :  { %405 = vmatprep.subr.bf16.mxu1 %v531_v0  ;;  %238 = vmatprep.subr.bf16.mxu0 %v449_v23 }
  0x46   :  { %406 = vmatpush3.bf16.msra.mxu1 %v451_v24  ;;  %239 = vmatpush1.bf16.msra.mxu0 %v452_v27 }
  0x49   :  { %408 = vmatmul.mubr.bf16.vlgmr.msra.gmra.mrb[0].mxu1 %v46_v28  ;;  %257 = vmatmul.mubr.bf16.vlgmr.msra.gmra.mrb[0].mxu0 %v46_v28 }
 0x11c   :  { %v301_v38 = vpop.f32.mrb[0].mxu1  ;;  %v258_v40 = vpop.f32.mrb[0].mxu0 }
 0x11d   :  { %v302_v39 = vadd.f32 %v301_v38, %v92_v35  ;;  %v409_v41 = vpop.f32.mrb[1].mxu1  ;;  %v259_v42 = vadd.f32 %v258_v40, %v84_v36  ;;  %v260_v43 = vpop.f32.mrb[1].mxu0 }
 0x11e   :  { %v304_v44 = vpop.f32.mrb[2].mxu1  ;;  %v261_v46 = vadd.f32 %v260_v43, %v88_v37  ;;  %v262_v48 = vpop.f32.mrb[2].mxu0 }
 0x11f   :  { %v379_v45 = vpack.c.bf16 %v302_v39, %v302_v39  ;;  %v305_v47 = vadd.f32 %v304_v44, %v92_v35  ;;  %v410_v49 = vpop.f32.mrb[3].mxu1  ;;  %v263_v50 = vadd.f32 %v262_v48, %v84_v36  ;;  %v264_v51 = vpop.f32.mrb[3].mxu0 }
 0x120   :  { %v378_v52 = vpack.c.bf16 %v261_v46, %v259_v42  ;;  %v265_v54 = vadd.f32 %v264_v51, %v88_v37 }
 0x121   :  { %329 = vst [vmem:[#allocation7 + $0x8] sm:$0xf] %v379_v45  ;;  %v381_v53 = vpack.c.bf16 %v305_v47, %v305_v47 }
 0x122   :  { %328 = vst [vmem:[#allocation7] sm:$0xff] %v378_v52  ;;  %v380_v55 = vpack.c.bf16 %v265_v54, %v263_v50 }
 0x123   :  { %331 = vst [vmem:[#allocation7 + $0x14] sm:$0xf] %v381_v53 }
 0x124   :  { %330 = vst [vmem:[#allocation7 + $0xc] sm:$0xff] %v380_v55 }
 0x125   :  { %508 = shalt.err (!%p505_p6)
}
 0x126   :  { %s509_s17 = scalar_lea.hbm %s603_s3, 384 }
 0x127   :  { %p510_p7 = scmp.ne.s32.totalorder %s603_s3, %s509_s17  ;;  %p513_p8 = scmp.lt.u32.totalorder %s509_s17, %s603_s3 }
 0x129   :  { %p515_p9 = pnand %p513_p8, %p510_p7 }
 0x12b   :  { %518 = shalt.err (!%p515_p9)
}
 0x12c   :  { %343 = dma.vmem_to_hbm [thread:$0]  %s338_s13, 384, %s603_s3, [#allocation4], %s529_s0, %s529_s0, %s530_s9  }
 0x12d   :  { %523 = dma.done.wait [#allocation4], 384  }
 0x12e   :  { %524 = vsyncadd [#allocation4], 4294966912 }
 0x12f   :  { %347 = vsyncpa [#allocation3], 1 }
 0x130   :  { %348 = vsyncpa [#allocation6], 1 }
 0x131   :  { %349 = vsyncpa [#allocation4], 1 }

</bundles_post_ra>
